<compile_context>
chip_gen: v5e
topology: v5e:2x2
jax: 0.10.0
libtpu: 0.0.40
codegen_flags: <defaults>
</compile_context>

<pallas_src>
import jax
import jax.numpy as jnp
from jax.experimental import pallas as pl
from jax.experimental.pallas import tpu as pltpu


# ----------------------------- Pallas kernel ------------------------------- #

def fused_stem_head_kernel(x_ref, ws_ref, bs_ref, wh_ref, bh_ref, o_ref):
    """One (batch, row-tile) step of: 3x3 conv (SAME, bias) + ReLU + 1x1 conv.

    x_ref : (Cin, H, W)        full NCHW image for this batch element
                               (block index constant across row tiles -> resident)
    ws_ref: (hidden, 9*Cin)    stem weights, im2col-flattened (kh, kw, ci), transposed, bf16
    bs_ref: (hidden, 1)        stem bias (BN folded), f32
    wh_ref: (Cout, hidden)     head 1x1 weights, transposed, bf16
    bh_ref: (Cout, 1)          head bias, f32
    o_ref : (Cout, tile_h*W)   lane-dense output tile (already NCHW-flattened)
    """
    Cin, H, W = x_ref.shape
    Cout, tile_pix = o_ref.shape
    tile_h = tile_pix // W

    r = pl.program_id(1)
    n_tiles = pl.num_programs(1)
    row0 = pl.multiple_of(r * tile_h, tile_h)

    # ---- tile rows + 1-row halo; zero ONLY at the true image border --------
    body = x_ref[:, pl.ds(row0, tile_h), :]                          # (Cin, tile_h, W)
    top = x_ref[:, pl.ds(jnp.maximum(row0 - 1, 0), 1), :]            # (Cin, 1, W)
    top = jnp.where(r == 0, jnp.zeros_like(top), top)
    bot = x_ref[:, pl.ds(jnp.minimum(row0 + tile_h, H - 1), 1), :]   # (Cin, 1, W)
    bot = jnp.where(r == n_tiles - 1, jnp.zeros_like(bot), bot)
    xpad = jnp.concatenate([top, body, bot], axis=1)                 # (Cin, tile_h+2, W)

    # ---- im2col, transposed: taps on sublanes, pixels on lanes -------------
    col = jax.lax.broadcasted_iota(jnp.int32, (Cin, tile_h, W), 2)

    def tap(kh, kw):
        slab = xpad[:, kh:kh + tile_h, :]            # kh shift = aligned row select
        if kw == 1:
            return slab
        # kw shift on the lane axis via the XLU, then mask in the 'same' zero pad.
        rolled = pltpu.roll(slab, shift=(1 - kw) % W, axis=2)
        edge = 0 if kw == 0 else W - 1
        return jnp.where(col == edge, 0.0, rolled)

    patches = jnp.concatenate(
        [tap(kh, kw) for kh in range(3) for kw in range(3)], axis=0
    ).reshape(9 * Cin, tile_pix).astype(jnp.bfloat16)
    # TODO(synk): on v7x, if VMEM-tight at full resolution, split into 3
    # accumulating K=3*Cin matmuls (one per kh) to shrink the patch buffer 3x,
    # and cast per-tap to bf16 before the concatenate.

    # ---- stem 3x3 conv as ONE MXU matmul; bias + ReLU epilogue in f32 ------
    h = jnp.dot(ws_ref[...], patches, preferred_element_type=jnp.float32)
    h = jnp.maximum(h + bs_ref[...], 0.0)                            # (hidden, tile_pix)

    # ---- head 1x1 conv fused; result is already (Cout, pix): no transpose --
    y = jnp.dot(wh_ref[...], h.astype(jnp.bfloat16),
                preferred_element_type=jnp.float32) + bh_ref[...]
    o_ref[...] = y.astype(o_ref.dtype)


# ------------------------------ JAX wrapper -------------------------------- #

def _pick_tile_h(H, W, max_tile_pix):
    """Largest row-tile dividing H with tile_h*W a multiple of 128 (unmasked vst)
    and at most max_tile_pix pixels. Falls back to the whole image."""
    best = None
    for th in range(1, H + 1):
        if H % th == 0 and (th * W) % 128 == 0 and th * W <= max_tile_pix:
            best = th
    return best if best is not None else H


def wrapped_model_forward(x_nchw, params, *, max_tile_pix=32 * 1024):
    """WrappedModel.forward: inner_model(input)[0] (main segmentation head).

    The aux head (params["aux_*"]) is discarded by the wrapper, so it is never
    computed — its FLOPs and HBM writeback are dropped entirely.
    """
    N, Cin, H, W = x_nchw.shape
    stem_w = params["stem_w"]                     # (3, 3, Cin, hidden) HWIO
    hidden = stem_w.shape[-1]
    head_w = params["head_w"]                     # (hidden, Cout)
    Cout = head_w.shape[-1]

    tile_h = _pick_tile_h(H, W, max_tile_pix)
    n_tiles = H // tile_h
    tile_pix = tile_h * W

    # One-time wrapper-side weight prep: transposed im2col weights in bf16
    # (MXU-native on all generations), biases as (C, 1) f32 columns.
    ws_t = stem_w.reshape(9 * Cin, hidden).T.astype(jnp.bfloat16)    # (hidden, 9*Cin)
    wh_t = head_w.T.astype(jnp.bfloat16)                             # (Cout, hidden)
    bs = params["stem_b"].reshape(hidden, 1).astype(jnp.float32)
    bh = params["head_b"].reshape(Cout, 1).astype(jnp.float32)

    out = pl.pallas_call(
        fused_stem_head_kernel,
        out_shape=jax.ShapeDtypeStruct((N, Cout, H * W), x_nchw.dtype),
        grid_spec=pltpu.PrefetchScalarGridSpec(
            num_scalar_prefetch=0,
            grid=(N, n_tiles),
            in_specs=[
                # Full image per batch element; block index constant across r,
                # so it is DMA'd once per n and stays resident across row tiles.
                pl.BlockSpec((None, Cin, H, W), lambda n, r: (n, 0, 0, 0)),
                pl.BlockSpec((hidden, 9 * Cin), lambda n, r: (0, 0)),
                pl.BlockSpec((hidden, 1), lambda n, r: (0, 0)),
                pl.BlockSpec((Cout, hidden), lambda n, r: (0, 0)),
                pl.BlockSpec((Cout, 1), lambda n, r: (0, 0)),
            ],
            # Lane-dense output tile: last dim tile_h*W is a multiple of 128.
            out_specs=pl.BlockSpec((None, Cout, tile_pix), lambda n, r: (n, 0, r)),
        ),
        compiler_params=pltpu.CompilerParams(
            dimension_semantics=("parallel", "parallel"),
            vmem_limit_bytes=48 * 1024 * 1024,   # above default scoped limit, < v7x 64 MiB
        ),
        # TODO(synk): on v5e, if DMA is still exposed at full resolution, add
        # pipeline_mode=pl.Buffered(3) on the streaming input spec.
    )(x_nchw, ws_t, bs, wh_t, bh)

    # (N, Cout, H*W) is already NCHW-flattened: cheap reshape, no transpose.
    return out.reshape(N, Cout, H, W)


# --------------------------- reference / params ----------------------------- #

def make_params(key, cin, hidden, num_classes):
    k = jax.random.split(key, 6)
    scale = 0.1
    return {
        "stem_w": scale * jax.random.normal(k[0], (3, 3, cin, hidden), jnp.float32),
        "stem_b": scale * jax.random.normal(k[1], (hidden,), jnp.float32),
        "head_w": scale * jax.random.normal(k[2], (hidden, num_classes), jnp.float32),
        "head_b": scale * jax.random.normal(k[3], (num_classes,), jnp.float32),
        # Aux head exists on the inner model but WrappedModel discards output[1],
        # so these parameters are intentionally never used by the kernel path.
        "aux_w":  scale * jax.random.normal(k[4], (hidden, num_classes), jnp.float32),
        "aux_b":  scale * jax.random.normal(k[5], (num_classes,), jnp.float32),
    }
    # TODO(synk): the real BiSeNetV2 has many more backbone stages + bilinear
    # upsampling of the heads; this synthetic inner model keeps only the conv
    # hot path that the wrapper's output depends on.


def reference_forward(x_nchw, params):
    """Pure-JAX reference for the wrapped forward (main head only)."""
    x = jnp.transpose(x_nchw, (0, 2, 3, 1))
    h = jax.lax.conv_general_dilated(
        x, params["stem_w"], window_strides=(1, 1), padding="SAME",
        dimension_numbers=("NHWC", "HWIO", "NHWC"))
    h = jnp.maximum(h + params["stem_b"], 0.0)
    y = jnp.einsum("nhwc,cd->nhwd", h, params["head_w"]) + params["head_b"]
    return jnp.transpose(y, (0, 3, 1, 2))


# --------------------------------- main ------------------------------------ #

if __name__ == "__main__":
    key = jax.random.PRNGKey(0)
    k_x, k_p = jax.random.split(key)

    N, C, H, W = 2, 4, 16, 16          # small NCHW input, PyTorch convention
    hidden, num_classes = 16, 8

    x = jax.random.normal(k_x, (N, C, H, W), jnp.float32)
    params = make_params(k_p, C, hidden, num_classes)

    # max_tile_pix=128 forces tile_h=8 -> grid (2, 2), so both the image-border
    # (zero halo) and interior tile-seam (neighbor-row halo) paths are exercised.
    fwd = jax.jit(lambda xx, pp: wrapped_model_forward(xx, pp, max_tile_pix=128))
    out = jax.block_until_ready(fwd(x, params))

    assert out.shape == (N, num_classes, H, W), out.shape
    assert out.dtype == jnp.float32

    ref = reference_forward(x, params)
    max_err = float(jnp.max(jnp.abs(out - ref)))
    assert jnp.allclose(out, ref, atol=5e-2, rtol=5e-2), max_err

    print("KERNEL_OK")
</pallas_src>

<mosaic_0001>
module attributes {stable_mosaic.version = 11 : i64} {
  func.func @fused_stem_head_kernel(%arg0: i32, %arg1: i32, %arg2: memref<1x4x16x16xf32, #tpu.memory_space<vmem>>, %arg3: memref<16x36xbf16, #tpu.memory_space<vmem>>, %arg4: memref<16x1xf32, #tpu.memory_space<vmem>>, %arg5: memref<8x16xbf16, #tpu.memory_space<vmem>>, %arg6: memref<8x1xf32, #tpu.memory_space<vmem>>, %arg7: memref<1x8x128xf32, #tpu.memory_space<vmem>>) attributes {dimension_semantics = [#tpu.dimension_semantics<parallel>, #tpu.dimension_semantics<parallel>], iteration_bounds = array<i64: 2, 2>, scalar_prefetch = 0 : i64, scratch_operands = 0 : i64, tpu.core_type = #tpu.core_type<tc>, window_params = [{transform_indices = @transform_0, window_bounds = array<i64: 1, 4, 16, 16>}, {pipeline_mode = #tpu.pipeline_mode<synchronous>, transform_indices = @transform_1, window_bounds = array<i64: 16, 36>}, {pipeline_mode = #tpu.pipeline_mode<synchronous>, transform_indices = @transform_2, window_bounds = array<i64: 16, 1>}, {pipeline_mode = #tpu.pipeline_mode<synchronous>, transform_indices = @transform_3, window_bounds = array<i64: 8, 16>}, {pipeline_mode = #tpu.pipeline_mode<synchronous>, transform_indices = @transform_4, window_bounds = array<i64: 8, 1>}, {transform_indices = @transform_5, window_bounds = array<i64: 1, 8, 128>}]} {
    %c8_i32 = arith.constant 8 : i32
    %0 = arith.muli %arg1, %c8_i32 : i32
    %1 = tpu.assume_multiple %0, 8 : i32
    %c0 = arith.constant 0 : index
    %c0_0 = arith.constant 0 : index
    %2 = arith.index_cast %1 : i32 to index
    %c0_1 = arith.constant 0 : index
    %3 = vector.load %arg2[%c0, %c0_0, %2, %c0_1] : memref<1x4x16x16xf32, #tpu.memory_space<vmem>>, vector<1x4x8x16xf32>
    %4 = vector.shape_cast %3 : vector<1x4x8x16xf32> to vector<4x8x16xf32>
    %c1_i32 = arith.constant 1 : i32
    %5 = arith.subi %1, %c1_i32 : i32
    %c0_i32 = arith.constant 0 : i32
    %6 = arith.maxsi %5, %c0_i32 : i32
    %c0_2 = arith.constant 0 : index
    %c0_3 = arith.constant 0 : index
    %7 = arith.index_cast %6 : i32 to index
    %c0_4 = arith.constant 0 : index
    %8 = vector.load %arg2[%c0_2, %c0_3, %7, %c0_4] : memref<1x4x16x16xf32, #tpu.memory_space<vmem>>, vector<1x4x1x16xf32>
    %9 = vector.shape_cast %8 : vector<1x4x1x16xf32> to vector<4x1x16xf32>
    %c0_i32_5 = arith.constant 0 : i32
    %10 = arith.cmpi eq, %arg1, %c0_i32_5 : i32
    %cst = arith.constant 0.000000e+00 : f32
    %11 = vector.broadcast %cst : f32 to vector<4x1x16xf32>
    %12 = arith.select %10, %11, %9 : vector<4x1x16xf32>
    %c8_i32_6 = arith.constant 8 : i32
    %13 = arith.addi %1, %c8_i32_6 : i32
    %c15_i32 = arith.constant 15 : i32
    %14 = arith.minsi %13, %c15_i32 : i32
    %c0_7 = arith.constant 0 : index
    %c0_8 = arith.constant 0 : index
    %15 = arith.index_cast %14 : i32 to index
    %c0_9 = arith.constant 0 : index
    %16 = vector.load %arg2[%c0_7, %c0_8, %15, %c0_9] : memref<1x4x16x16xf32, #tpu.memory_space<vmem>>, vector<1x4x1x16xf32>
    %17 = vector.shape_cast %16 : vector<1x4x1x16xf32> to vector<4x1x16xf32>
    %c1_i32_10 = arith.constant 1 : i32
    %18 = arith.cmpi eq, %arg1, %c1_i32_10 : i32
    %cst_11 = arith.constant 0.000000e+00 : f32
    %19 = vector.broadcast %cst_11 : f32 to vector<4x1x16xf32>
    %20 = arith.select %18, %19, %17 : vector<4x1x16xf32>
    %21 = tpu.concatenate %12, %4, %20 in 1 : vector<4x1x16xf32>, vector<4x8x16xf32>, vector<4x1x16xf32> -> vector<4x10x16xf32>
    %22 = tpu.iota {dimensions = array<i32: 2>} : vector<4x8x16xi32>
    %23 = vector.extract_strided_slice %21 {offsets = [0, 0, 0], sizes = [4, 8, 16], strides = [1, 1, 1]} : vector<4x10x16xf32> to vector<4x8x16xf32>
    %c1_i32_12 = arith.constant 1 : i32
    %24 = tpu.dynamic_rotate %23 by %c1_i32_12 dim 2 : vector<4x8x16xf32>, i32 -> vector<4x8x16xf32>
    %c0_i32_13 = arith.constant 0 : i32
    %25 = vector.broadcast %c0_i32_13 : i32 to vector<4x8x16xi32>
    %26 = arith.cmpi eq, %22, %25 : vector<4x8x16xi32>
    %cst_14 = arith.constant 0.000000e+00 : f32
    %27 = vector.broadcast %cst_14 : f32 to vector<4x8x16xf32>
    %28 = arith.select %26, %27, %24 : vector<4x8x16xi1>, vector<4x8x16xf32>
    %29 = vector.extract_strided_slice %21 {offsets = [0, 0, 0], sizes = [4, 8, 16], strides = [1, 1, 1]} : vector<4x10x16xf32> to vector<4x8x16xf32>
    %30 = vector.extract_strided_slice %21 {offsets = [0, 0, 0], sizes = [4, 8, 16], strides = [1, 1, 1]} : vector<4x10x16xf32> to vector<4x8x16xf32>
    %c15_i32_15 = arith.constant 15 : i32
    %31 = tpu.dynamic_rotate %30 by %c15_i32_15 dim 2 : vector<4x8x16xf32>, i32 -> vector<4x8x16xf32>
    %c15_i32_16 = arith.constant 15 : i32
    %32 = vector.broadcast %c15_i32_16 : i32 to vector<4x8x16xi32>
    %33 = arith.cmpi eq, %22, %32 : vector<4x8x16xi32>
    %cst_17 = arith.constant 0.000000e+00 : f32
    %34 = vector.broadcast %cst_17 : f32 to vector<4x8x16xf32>
    %35 = arith.select %33, %34, %31 : vector<4x8x16xi1>, vector<4x8x16xf32>
    %36 = vector.extract_strided_slice %21 {offsets = [0, 1, 0], sizes = [4, 8, 16], strides = [1, 1, 1]} : vector<4x10x16xf32> to vector<4x8x16xf32>
    %c1_i32_18 = arith.constant 1 : i32
    %37 = tpu.dynamic_rotate %36 by %c1_i32_18 dim 2 : vector<4x8x16xf32>, i32 -> vector<4x8x16xf32>
    %c0_i32_19 = arith.constant 0 : i32
    %38 = vector.broadcast %c0_i32_19 : i32 to vector<4x8x16xi32>
    %39 = arith.cmpi eq, %22, %38 : vector<4x8x16xi32>
    %cst_20 = arith.constant 0.000000e+00 : f32
    %40 = vector.broadcast %cst_20 : f32 to vector<4x8x16xf32>
    %41 = arith.select %39, %40, %37 : vector<4x8x16xi1>, vector<4x8x16xf32>
    %42 = vector.extract_strided_slice %21 {offsets = [0, 1, 0], sizes = [4, 8, 16], strides = [1, 1, 1]} : vector<4x10x16xf32> to vector<4x8x16xf32>
    %43 = vector.extract_strided_slice %21 {offsets = [0, 1, 0], sizes = [4, 8, 16], strides = [1, 1, 1]} : vector<4x10x16xf32> to vector<4x8x16xf32>
    %c15_i32_21 = arith.constant 15 : i32
    %44 = tpu.dynamic_rotate %43 by %c15_i32_21 dim 2 : vector<4x8x16xf32>, i32 -> vector<4x8x16xf32>
    %c15_i32_22 = arith.constant 15 : i32
    %45 = vector.broadcast %c15_i32_22 : i32 to vector<4x8x16xi32>
    %46 = arith.cmpi eq, %22, %45 : vector<4x8x16xi32>
    %cst_23 = arith.constant 0.000000e+00 : f32
    %47 = vector.broadcast %cst_23 : f32 to vector<4x8x16xf32>
    %48 = arith.select %46, %47, %44 : vector<4x8x16xi1>, vector<4x8x16xf32>
    %49 = vector.extract_strided_slice %21 {offsets = [0, 2, 0], sizes = [4, 8, 16], strides = [1, 1, 1]} : vector<4x10x16xf32> to vector<4x8x16xf32>
    %c1_i32_24 = arith.constant 1 : i32
    %50 = tpu.dynamic_rotate %49 by %c1_i32_24 dim 2 : vector<4x8x16xf32>, i32 -> vector<4x8x16xf32>
    %c0_i32_25 = arith.constant 0 : i32
    %51 = vector.broadcast %c0_i32_25 : i32 to vector<4x8x16xi32>
    %52 = arith.cmpi eq, %22, %51 : vector<4x8x16xi32>
    %cst_26 = arith.constant 0.000000e+00 : f32
    %53 = vector.broadcast %cst_26 : f32 to vector<4x8x16xf32>
    %54 = arith.select %52, %53, %50 : vector<4x8x16xi1>, vector<4x8x16xf32>
    %55 = vector.extract_strided_slice %21 {offsets = [0, 2, 0], sizes = [4, 8, 16], strides = [1, 1, 1]} : vector<4x10x16xf32> to vector<4x8x16xf32>
    %56 = vector.extract_strided_slice %21 {offsets = [0, 2, 0], sizes = [4, 8, 16], strides = [1, 1, 1]} : vector<4x10x16xf32> to vector<4x8x16xf32>
    %c15_i32_27 = arith.constant 15 : i32
    %57 = tpu.dynamic_rotate %56 by %c15_i32_27 dim 2 : vector<4x8x16xf32>, i32 -> vector<4x8x16xf32>
    %c15_i32_28 = arith.constant 15 : i32
    %58 = vector.broadcast %c15_i32_28 : i32 to vector<4x8x16xi32>
    %59 = arith.cmpi eq, %22, %58 : vector<4x8x16xi32>
    %cst_29 = arith.constant 0.000000e+00 : f32
    %60 = vector.broadcast %cst_29 : f32 to vector<4x8x16xf32>
    %61 = arith.select %59, %60, %57 : vector<4x8x16xi1>, vector<4x8x16xf32>
    %62 = tpu.concatenate %28, %29, %35, %41, %42, %48, %54, %55, %61 in 0 : vector<4x8x16xf32>, vector<4x8x16xf32>, vector<4x8x16xf32>, vector<4x8x16xf32>, vector<4x8x16xf32>, vector<4x8x16xf32>, vector<4x8x16xf32>, vector<4x8x16xf32>, vector<4x8x16xf32> -> vector<36x8x16xf32>
    %63 = vector.shape_cast %62 : vector<36x8x16xf32> to vector<36x128xf32>
    %64 = arith.truncf %63 : vector<36x128xf32> to vector<36x128xbf16>
    %c0_30 = arith.constant 0 : index
    %c0_31 = arith.constant 0 : index
    %65 = vector.load %arg3[%c0_30, %c0_31] : memref<16x36xbf16, #tpu.memory_space<vmem>>, vector<16x36xbf16>
    %cst_32 = arith.constant dense<0.000000e+00> : vector<16x128xf32>
    %66 = tpu.matmul %65, %64, %cst_32 {dimension_numbers = #tpu.dot_dimension_numbers<[1], [0], [0], [1], [0, 0, 1, 1], [], []>} : vector<16x36xbf16>, vector<36x128xbf16>, vector<16x128xf32> -> vector<16x128xf32>
    %c0_33 = arith.constant 0 : index
    %c0_34 = arith.constant 0 : index
    %67 = vector.load %arg4[%c0_33, %c0_34] : memref<16x1xf32, #tpu.memory_space<vmem>>, vector<16x1xf32>
    %68 = vector.broadcast %67 : vector<16x1xf32> to vector<16x128xf32>
    %69 = arith.addf %66, %68 : vector<16x128xf32>
    %cst_35 = arith.constant 0.000000e+00 : f32
    %70 = vector.broadcast %cst_35 : f32 to vector<16x128xf32>
    %71 = arith.maximumf %69, %70 : vector<16x128xf32>
    %c0_36 = arith.constant 0 : index
    %c0_37 = arith.constant 0 : index
    %72 = vector.load %arg5[%c0_36, %c0_37] : memref<8x16xbf16, #tpu.memory_space<vmem>>, vector<8x16xbf16>
    %73 = arith.truncf %71 : vector<16x128xf32> to vector<16x128xbf16>
    %cst_38 = arith.constant dense<0.000000e+00> : vector<8x128xf32>
    %74 = tpu.matmul %72, %73, %cst_38 {dimension_numbers = #tpu.dot_dimension_numbers<[1], [0], [0], [1], [0, 0, 1, 1], [], []>} : vector<8x16xbf16>, vector<16x128xbf16>, vector<8x128xf32> -> vector<8x128xf32>
    %c0_39 = arith.constant 0 : index
    %c0_40 = arith.constant 0 : index
    %75 = vector.load %arg6[%c0_39, %c0_40] : memref<8x1xf32, #tpu.memory_space<vmem>>, vector<8x1xf32>
    %76 = vector.broadcast %75 : vector<8x1xf32> to vector<8x128xf32>
    %77 = arith.addf %74, %76 : vector<8x128xf32>
    %c0_41 = arith.constant 0 : index
    %c0_42 = arith.constant 0 : index
    %c0_43 = arith.constant 0 : index
    %78 = vector.load %arg7[%c0_41, %c0_42, %c0_43] : memref<1x8x128xf32, #tpu.memory_space<vmem>>, vector<1x8x128xf32>
    %79 = vector.shape_cast %78 : vector<1x8x128xf32> to vector<8x128xf32>
    %80 = vector.shape_cast %77 : vector<8x128xf32> to vector<1x8x128xf32>
    tpu.vector_store %arg7[%c0_41, %c0_42, %c0_43], %80 {strides = array<i32>} : memref<1x8x128xf32, #tpu.memory_space<vmem>>, vector<1x8x128xf32>,
    return
  }
  func.func @transform_0(%arg0: i32, %arg1: i32) -> (i32, i32, i32, i32) {
    %c0_i32 = arith.constant 0 : i32
    %c0_i32_0 = arith.constant 0 : i32
    %c0_i32_1 = arith.constant 0 : i32
    %c0_i32_2 = arith.constant 0 : i32
    return %arg0, %c0_i32, %c0_i32_0, %c0_i32_1 : i32, i32, i32, i32
  }
  func.func @transform_1(%arg0: i32, %arg1: i32) -> (i32, i32) {
    %c0_i32 = arith.constant 0 : i32
    %c0_i32_0 = arith.constant 0 : i32
    %c0_i32_1 = arith.constant 0 : i32
    return %c0_i32, %c0_i32_0 : i32, i32
  }
  func.func @transform_2(%arg0: i32, %arg1: i32) -> (i32, i32) {
    %c0_i32 = arith.constant 0 : i32
    %c0_i32_0 = arith.constant 0 : i32
    %c0_i32_1 = arith.constant 0 : i32
    return %c0_i32, %c0_i32_0 : i32, i32
  }
  func.func @transform_3(%arg0: i32, %arg1: i32) -> (i32, i32) {
    %c0_i32 = arith.constant 0 : i32
    %c0_i32_0 = arith.constant 0 : i32
    %c0_i32_1 = arith.constant 0 : i32
    return %c0_i32, %c0_i32_0 : i32, i32
  }
  func.func @transform_4(%arg0: i32, %arg1: i32) -> (i32, i32) {
    %c0_i32 = arith.constant 0 : i32
    %c0_i32_0 = arith.constant 0 : i32
    %c0_i32_1 = arith.constant 0 : i32
    return %c0_i32, %c0_i32_0 : i32, i32
  }
  func.func @transform_5(%arg0: i32, %arg1: i32) -> (i32, i32, i32) {
    %c0_i32 = arith.constant 0 : i32
    %c0_i32_0 = arith.constant 0 : i32
    return %arg0, %c0_i32, %arg1 : i32, i32, i32
  }
}

</mosaic_0001>

<bundles_post_ra>
// kernel: _lambda_.1
= control target key start
LH: loop header
LB: loop body
LE: loop exit
PB: predicated region body
PF: predicated region fallthrough
CT: control target
= control target key end

     0   :  { %s1734_s18 = smov 0   ;;  %s1736_s19 = smov 0   ;;  %s2609_s0 = inlined_call_operand.vmem [shape: f32[2,4,16,16], index: 0, kind: input, shape index: {}]   ;;  %s2610_s1 = inlined_call_operand.vmem [shape: bf16[16,36], index: 1, kind: input, shape index: {}]   ;;  %s2611_s2 = inlined_call_operand.vmem [shape: f32[16,1], index: 2, kind: input, shape index: {}]   ;;  %s2612_s3 = inlined_call_operand.vmem [shape: bf16[8,16], index: 3, kind: input, shape index: {}]   ;;  %s2613_s4 = inlined_call_operand.vmem [shape: f32[8,1], index: 4, kind: input, shape index: {}]   ;;  %s2614_s5 = inlined_call_operand.vmem [shape: f32[2,8,256], index: 5, kind: output, shape index: {}]  }
   0x1   :  { %s1738_s20 = smov 0   ;;  %s1740_s21 = smov 0  }
   0x2   :  { %s1742_s22 = smov 0  }
   0x3 LB: > { %s24_s23 = sadd.s32 1, %s1682_s20  ;;  %s27_s24 = sadd.s32 1, %s1686_s21  ;;  %s1690_s22 = sphi %s1742_s22, %s15_s22   ;;  %s1686_s21 = sphi %s1740_s21, %s2652_s21   ;;  %s1682_s20 = sphi %s1738_s20, %s2651_s20   ;;  %s1678_s19 = sphi %s1736_s19, %s2650_s19   ;;  %s1674_s18 = sphi %s1734_s18, %s2649_s18  }
   0x4   : > { %p25_p0 = scmp.ge.s32.totalorder %s24_s23, 2  ;;  %p1390_p1 = scmp.ge.s32.totalorder %s1690_s22, 1 }
   0x5   : > { %p201_p2 = scmp.lt.s32.totalorder %s1690_s22, 5 }
   0x6   : > { %s2654_s23 = smov (%p25_p0, %s24_s23), 0  ;;  %s2656_s24 = smov (!%p25_p0, %s27_s24), %s1686_s21 }
   0x7   : > { %p202_p3 = pnand %p1390_p1, %p201_p2  ;;  %p29_p4 = scmp.ge.s32.totalorder %s2656_s24, 2 }
   0x9   : > { %s2658_s24 = smov (%p29_p4, %s2656_s24), 0  ;;  %205 = sbr.rel (%p202_p3) target bundleno = 900 (0x384), region = 40 }
   0xe   : > { %p232_p5 = scmp.lt.s32.totalorder %s1678_s19, 1  ;;  %s1395_s25 = sshll.u32 %s1674_s18, 3  ;;  %vm308_vm0 = vcmask 1040384   ;;  %vm467_vm2 = vcmask 1045504   ;;  %vm390_vm4 = vcmask 1046528   ;;  %vm319_vm5 = vcmask 1047680  }
   0xf   : > { %s1396_s26 = sadd.s32 4294967295, %s1395_s25  ;;  %s268_s27 = sadd.s32 8, %s1395_s25  ;;  %vm545_vm6 = vcmask 1047556   ;;  %vm1189_vm9 = vcmask 130048   ;;  %vm1195_vm10 = vcmask 261120   ;;  %vm1201_vm11 = vcmask 392192  }
  0x10   : > { %s2660_s19 = smov (!%p232_p5, %s1678_s19), 1  ;;  %p253_p6 = scmp.gt.s32.totalorder %s1396_s26, 0  ;;  %vm1207_vm12 = vcmask 523264   ;;  %vm1213_vm13 = vcmask 654336   ;;  %vm1219_vm14 = vcmask 785408   ;;  %vm1225_vm15 = vcmask 916480  }
  0x11   : > { %s1405_s28 = sshll.u32 %s2660_s19, 6  ;;  %p260_p7 = scmp.eq.s32.totalorder %s1674_s18, 0 }
  0x12   : > { %s236_s6 = scalar_lea.vmem %s2609_s0, %s1405_s28  ;;  %p1774_p8 = scmp.lt.s32.totalorder %s268_s27, 15 }
  0x13   : > { %s247_s8 = scalar_lea.vmem %s236_s6, %s1395_s25  ;;  %p276_p9 = scmp.eq.s32.totalorder %s1674_s18, 1 }
  0x14   : > { %v249_v0 = vld [vmem:[%s247_s8 + $0x10] sm:$0xff]  ;;  %s2662_s26 = smov (!%p253_p6, %s1396_s26), 0  ;;  %v250_v2 = vld [vmem:[%s247_s8 + $0x20] sm:$0xff]  ;;  %s2664_s27 = smov (!%p1774_p8, %s268_s27), 15 }
  0x15   : > { %v251_v1 = vld [vmem:[%s247_s8 + $0x30] sm:$0xff]  ;;  %s261_s9 = scalar_select %p260_p7, 1, 0  ;;  %v289_v3 = vrot.slane %v249_v0, 7  ;;  %v248_v5 = vld [vmem:[%s247_s8] sm:$0xff]  ;;  %v290_v9 = vrot.slane %v250_v2, 7 }
  0x16   : > { %s255_s10 = scalar_lea.vmem %s236_s6, %s2662_s26  ;;  %v291_v4 = vrot.slane %v251_v1, 7  ;;  %s271_s12 = scalar_lea.vmem %s236_s6, %s2664_s27  ;;  %v288_v16 = vrot.slane %v248_v5, 7 }
  0x17   : > { %v257_v6 = vld [vmem:[%s255_s10 + $0x10] sm:$0x1]  ;;  %v262_v8 = vstv %s261_s9  ;;  %s277_s11 = scalar_select %p276_p9, 1, 0  ;;  %v258_v11 = vld [vmem:[%s255_s10 + $0x20] sm:$0x1] }
  0x18   : > { %v259_v7 = vld [vmem:[%s255_s10 + $0x30] sm:$0x1]  ;;  %vm1781_vm1 = vcmp.eq.s32.totalorder %v262_v8, 1  ;;  %v256_v15 = vld [vmem:[%s255_s10] sm:$0x1]  ;;  %s1692_s13 = smov 16  }
  0x19   : > { %v265_v12 = vsel %vm1781_vm1, 0.0, %v257_v6  ;;  %v267_v13 = vsel %vm1781_vm1, 0.0, %v259_v7  ;;  %v266_v14 = vsel %vm1781_vm1, 0.0, %v258_v11  ;;  %v273_v17 = vld [vmem:[%s271_s12 + $0x10] sm:$0x1]  ;;  %v278_v19 = vstv %s277_s11  ;;  %s1693_s14 = smov 127  }
  0x1a   : > { %v275_v18 = vld [vmem:[%s271_s12 + $0x30] sm:$0x1]  ;;  %v1794_v20 = vsel %vm308_vm0, %v265_v12, %v289_v3  ;;  %v1797_v21 = vsel %vm308_vm0, %v267_v13, %v291_v4  ;;  %v274_v22 = vld [vmem:[%s271_s12 + $0x20] sm:$0x1]  ;;  %vm1799_vm3 = vcmp.eq.s32.totalorder %v278_v19, 1  ;;  %v1805_v25 = vsel %vm308_vm0, %v266_v14, %v290_v9  ;;  %s1694_s15 = smov 113  }
  0x1b   : > { %v471_v24 = vrot.slane %v1794_v20, 2  ;;  %v272_v26 = vld [vmem:[%s271_s12] sm:$0x1]  ;;  %v281_v27 = vsel %vm1799_vm3, 0.0, %v273_v17  ;;  %v283_v28 = vsel %vm1799_vm3, 0.0, %v275_v18  ;;  %v477_v29 = vrot.slane %v1797_v21, 2 }
  0x1c   : > { %v282_v30 = vsel %vm1799_vm3, 0.0, %v274_v22  ;;  %v301_v31 = vrot.slane %v281_v27, 7  ;;  %v303_v32 = vrot.slane %v283_v28, 7  ;;  %v264_v34 = vsel %vm1781_vm1, 0.0, %v256_v15  ;;  %s1697_s16 = smov 32   ;;  %s1698_s17 = smov 64  }
  0x1d   : > { %v302_v33 = vrot.slane %v282_v30, 7  ;;  %v397_v35 = vrot.slane %v1805_v25, 1  ;;  %v400_v36 = vrot.slane %v1797_v21, 1  ;;  %v280_v37 = vsel %vm1799_vm3, 0.0, %v272_v26  ;;  %s1699_s25 = smov 48   ;;  %s1700_s26 = smov 96  }
  0x1e   : > { %v1821_v38 = vsel %vm308_vm0, %v264_v34, %v288_v16  ;;  %v314_v39 = vsel %vm308_vm0, %v289_v3, %v301_v31  ;;  %v316_v40 = vsel %vm308_vm0, %v291_v4, %v303_v32  ;;  %v300_v42 = vrot.slane %v280_v37, 7  ;;  %s1701_s27 = smov 80   ;;  %s1702_s28 = smov 112  }
  0x1f   : > { %v315_v41 = vsel %vm308_vm0, %v290_v9, %v302_v33  ;;  %v472_v43 = vrot.slane %v314_v39, 2  ;;  %v478_v44 = vrot.slane %v316_v40, 2  ;;  %v474_v46 = vrot.slane %v1805_v25, 2  ;;  %p239_p10 = scmp.lt.s32.totalorder %s1674_s18, 1 }
  0x20   : > { %v398_v45 = vrot.slane %v315_v41, 1  ;;  %v401_v47 = vrot.slane %v316_v40, 1  ;;  %v475_v48 = vrot.slane %v315_v41, 2  ;;  %v313_v49 = vsel %vm308_vm0, %v288_v16, %v300_v42 }
  0x21   : > { %v468_v50 = vrot.slane %v1821_v38, 2  ;;  %v1830_v51 = vsel %vm467_vm2, %v471_v24, %v472_v43  ;;  %v1833_v52 = vsel %vm467_vm2, %v477_v29, %v478_v44  ;;  %v469_v54 = vrot.slane %v313_v49, 2  ;;  %s2666_s18 = smov (!%p239_p10, %s1674_s18), 1 }
  0x22   : > { %v1836_v53 = vsel %vm390_vm4, %v397_v35, %v398_v45  ;;  %v395_v55 = vrot.slane %v314_v39, 1  ;;  %v1459_v56 = vpack.i.bf16 %v1830_v51, %v1833_v52  ;;  %v1841_v57 = vsel %vm390_vm4, %v400_v36, %v401_v47 }
  0x23   : > { %v394_v58 = vrot.slane %v1794_v20, 1  ;;  %v1469_v59 = vpack.i.bf16 %v1841_v57, %v1836_v53  ;;  %v1849_v60 = vsel %vm467_vm2, %v468_v50, %v469_v54  ;;  %v1852_v61 = vsel %vm467_vm2, %v474_v46, %v475_v48 }
  0x24   : > { %1460 = vrot.lane.b32.xlu0 %v1459_v56, %s1692_s13  ;;  %v391_v62 = vrot.slane %v1821_v38, 1  ;;  %v392_v63 = vrot.slane %v313_v49, 1  ;;  %v1479_v1 = vpack.i.bf16 %v1794_v20, %v1797_v21  ;;  %v1464_v2 = vpack.i.bf16 %v1849_v60, %v1852_v61 }
  0x25   : > { %1470 = vrot.lane.b32.xlu1 %v1469_v59, %s1692_s13  ;;  %v1856_v0 = vsel %vm390_vm4, %v394_v58, %v395_v55  ;;  %v1484_v5 = vpack.i.bf16 %v1821_v38, %v1805_v25  ;;  %vm1257_vm0 = vcmask 1041408   ;;  %vm1253_vm1 = vcmask 293888  }
  0x26   : > { %v1863_v3 = vsel %vm390_vm4, %v391_v62, %v392_v63  ;;  %1480 = vrot.lane.b32.xlu2 %v1479_v1, %s1692_s13 }
  0x27   : > { %v1474_v4 = vpack.i.bf16 %v1856_v0, %v1863_v3 }
  0x2c   : > { %1465 = vrot.lane.b32.xlu0 %v1464_v2, %s1692_s13 }
  0x2d   : > { %1475 = vrot.lane.b32.xlu1 %v1474_v4, %s1692_s13 }
  0x2e   : > { %1485 = vrot.lane.b32.xlu2 %v1484_v5, %s1692_s13 }
  0x80   : > { %v1481_v6 = vpop.permute.xlu2 %1480 }
  0x81   : > { %v1483_v33 = vunpack.i.h.bf16 %v1481_v6  ;;  %v1482_v36 = vunpack.i.l.bf16 %v1481_v6 }
  0x83   : > { %v325_v43 = vsel %vm319_vm5, %v1483_v33, %v1794_v20  ;;  %v331_v44 = vsel %vm319_vm5, %v1482_v36, %v1797_v21  ;;  %v569_v36 = vrot.slane %v1805_v25, 4 }
  0x84   : > { %v1509_v45 = vpack.i.bf16 %v325_v43, %v331_v44  ;;  %v581_v44 = vrot.slane %v1797_v21, 4 }
  0x85   : > { %v570_v43 = vsel %vm545_vm6, %v569_v36, %v1821_v38 }
  0x88   : > { %v1486_v8 = vpop.permute.xlu2 %1485 }
  0x89   : > { %v1488_v16 = vunpack.i.h.bf16 %v1486_v8  ;;  %v1487_v22 = vunpack.i.l.bf16 %v1486_v8 }
  0x8b   : > { %v322_v26 = vsel %vm319_vm5, %v1488_v16, %v1821_v38  ;;  %v328_v27 = vsel %vm319_vm5, %v1487_v22, %v1805_v25 }
  0x8c   : > { %v1514_v37 = vpack.i.bf16 %v322_v26, %v328_v27 }
  0x96   : > { %v1461_v7 = vpop.permute.xlu0 %1460 }
  0x97   : > { %v1463_v9 = vunpack.i.h.bf16 %v1461_v7  ;;  %v1462_v10 = vunpack.i.l.bf16 %v1461_v7  ;;  %v1471_v11 = vpop.permute.xlu1 %1470 }
  0x98   : > { %v1473_v12 = vunpack.i.h.bf16 %v1471_v11  ;;  %v1472_v13 = vunpack.i.l.bf16 %v1471_v11 }
  0x99   : > { %v489_v14 = vsel %vm319_vm5, %v1463_v9, %v1830_v51  ;;  %v495_v15 = vsel %vm319_vm5, %v1462_v10, %v1833_v52 }
  0x9a   : > { %v1489_v17 = vpack.i.bf16 %v489_v14, %v495_v15  ;;  %v415_v18 = vsel %vm319_vm5, %v1472_v13, %v1836_v53  ;;  %v418_v19 = vsel %vm319_vm5, %v1473_v12, %v1841_v57 }
  0x9b   : > { %v1499_v23 = vpack.i.bf16 %v418_v19, %v415_v18 }
  0x9c   : > { %1490 = vrot.lane.b32.xlu0 %v1489_v17, %s1692_s13 }
  0x9d   : > { %1500 = vrot.lane.b32.xlu2 %v1499_v23, %s1692_s13 }
  0x9e   : > { %v1466_v24 = vpop.permute.xlu0 %1465 }
  0x9f   : > { %v1468_v28 = vunpack.i.h.bf16 %v1466_v24  ;;  %v1467_v29 = vunpack.i.l.bf16 %v1466_v24  ;;  %v1476_v30 = vpop.permute.xlu1 %1475 }
  0xa0   : > { %v1478_v31 = vunpack.i.h.bf16 %v1476_v30  ;;  %v1477_v32 = vunpack.i.l.bf16 %v1476_v30 }
  0xa1   : > { %v486_v34 = vsel %vm319_vm5, %v1468_v28, %v1849_v60  ;;  %v492_v35 = vsel %vm319_vm5, %v1467_v29, %v1852_v61 }
  0xa2   : > { %v1494_v39 = vpack.i.bf16 %v486_v34, %v492_v35  ;;  %v409_v40 = vsel %vm319_vm5, %v1477_v32, %v1863_v3  ;;  %v412_v41 = vsel %vm319_vm5, %v1478_v31, %v1856_v0  ;;  %v317_v35 = vlaneseq }
  0xa3   : > { %v1504_v42 = vpack.i.bf16 %v412_v41, %v409_v40  ;;  %v905_v41 = vrot.slane %v1852_v61, 4 }
  0xa4   : > { %1495 = vrot.lane.b32.xlu1 %v1494_v39, %s1692_s13 }
  0xa5   : > { %1505 = vrot.lane.b32.xlu0 %v1504_v42, %s1692_s13  ;;  %1515 = vrot.lane.b32.xlu2 %v1514_v37, %s1692_s13  ;;  %v1695_v37 = vmov 1983009808   ;;  %v1935_v42 = vand.u32 127, %v317_v35 }
  0xa6   : > { %v550_v39 = vunpack.c.l.s4 %v1695_v37 }
  0xa7   : > { %vm344_vm7 = vcmp.eq.s32.totalorder %v1935_v42, 0  ;;  %vm365_vm8 = vcmp.eq.s32.totalorder %v1935_v42, 15 }
  0xac   : > { %1510 = vrot.lane.b32.xlu1 %v1509_v45, %s1692_s13  ;;  %v583_v45 = vrot.slane %v1794_v20, 4 }
  0xf7   : > { %v1501_v46 = vpop.permute.xlu2 %1500 }
  0xf8   : > { %v1502_v11 = vunpack.i.l.bf16 %v1501_v46  ;;  %v1503_v19 = vunpack.i.h.bf16 %v1501_v46  ;;  %v1941_v46 = vunpack.c.0.s8 %v550_v39 }
  0xfa   : > { %v429_v14 = vsel %vm319_vm5, %v1502_v11, %v1836_v53  ;;  %v430_v24 = vsel %vm319_vm5, %v1503_v19, %v1841_v57 }
  0xfb   : > { %v1544_v30 = vpack.i.bf16 %v430_v24, %v429_v14 }
  0xff   : > { %v1516_v50 = vpop.permute.xlu2 %1515 }
 0x100   : > { %v1517_v58 = vunpack.i.l.bf16 %v1516_v50  ;;  %v1518_v28 = vunpack.i.h.bf16 %v1516_v50  ;;  %v906_v50 = vsel %vm545_vm6, %v905_v41, %v1849_v60 }
 0x102   : > { %v342_v1 = vsel %vm319_vm5, %v1517_v58, %v1805_v25  ;;  %v340_v31 = vsel %vm319_vm5, %v1518_v28, %v1821_v38  ;;  %v571_v58 = vrot.slane %v1821_v38, 4 }
 0x103   : > { %v1549_v33 = vpack.i.bf16 %v340_v31, %v342_v1 }
 0x104   : > { %v572_v11 = vsel %vm545_vm6, %v1805_v25, %v571_v58 }
 0x10e   : > { %v1491_v2 = vpop.permute.xlu0 %1490 }
 0x10f   : > { %v1493_v9 = vunpack.i.h.bf16 %v1491_v2  ;;  %v1492_v10 = vunpack.i.l.bf16 %v1491_v2 }
 0x111   : > { %v505_v12 = vsel %vm319_vm5, %v1493_v9, %v1830_v51  ;;  %v507_v13 = vsel %vm319_vm5, %v1492_v10, %v1833_v52 }
 0x112   : > { %v1539_v17 = vpack.i.bf16 %v505_v12, %v507_v13 }
 0x116   : > { %v1496_v47 = vpop.permute.xlu1 %1495 }
 0x117   : > { %v1498_v48 = vunpack.i.h.bf16 %v1496_v47  ;;  %v1497_v49 = vunpack.i.l.bf16 %v1496_v47  ;;  %v1506_v15 = vpop.permute.xlu0 %1505  ;;  %v917_v47 = vrot.slane %v1833_v52, 4 }
 0x118   : > { %v1508_v16 = vunpack.i.h.bf16 %v1506_v15  ;;  %v1507_v22 = vunpack.i.l.bf16 %v1506_v15 }
 0x119   : > { %v504_v54 = vsel %vm319_vm5, %v1498_v48, %v1849_v60  ;;  %v506_v55 = vsel %vm319_vm5, %v1497_v49, %v1852_v61  ;;  %v919_v49 = vrot.slane %v1830_v51, 4 }
 0x11a   : > { %v1534_v56 = vpack.i.bf16 %v504_v54, %v506_v55  ;;  %v1564_v18 = vpack.i.bf16 %v429_v14, %v504_v54  ;;  %v428_v23 = vsel %vm319_vm5, %v1508_v16, %v1856_v0  ;;  %v427_v26 = vsel %vm319_vm5, %v1507_v22, %v1863_v3 }
 0x11b   : > { %v1559_v27 = vpack.i.bf16 %v428_v23, %v427_v26  ;;  %v1569_v29 = vpack.i.bf16 %v427_v26, %v430_v24  ;;  %v1574_v32 = vpack.i.bf16 %v340_v31, %v428_v23  ;;  %v1949_v54 = vperm.slane %v570_v43, %v1941_v46 }
 0x11c   : > { %1535 = vrot.lane.b32.xlu1 %v1534_v56, %s1693_s14  ;;  %v582_v56 = vsel %vm545_vm6, %v581_v44, %v1794_v20  ;;  %v920_v2 = vsel %vm545_vm6, %v1833_v52, %v919_v49  ;;  %v1996_v22 = vperm.slane %v572_v11, %v1941_v46 }
 0x11d   : > { %v1983_v12 = vperm.slane %v920_v2, %v1941_v46 }
 0x11e   : > { %v1511_v59 = vpop.permute.xlu1 %1510 }
 0x11f   : > { %v1513_v62 = vunpack.i.h.bf16 %v1511_v59  ;;  %v1512_v63 = vunpack.i.l.bf16 %v1511_v59  ;;  %v584_v59 = vsel %vm545_vm6, %v1797_v21, %v583_v45 }
 0x121   : > { %v341_v4 = vsel %vm319_vm5, %v1513_v62, %v1794_v20  ;;  %v343_v5 = vsel %vm319_vm5, %v1512_v63, %v1797_v21  ;;  %v918_v62 = vsel %vm545_vm6, %v917_v47, %v1830_v51  ;;  %v907_v63 = vrot.slane %v1849_v60, 4 }
 0x122   : > { %v1524_v6 = vpack.i.bf16 %v342_v1, %v341_v4  ;;  %v1554_v7 = vpack.i.bf16 %v343_v5, %v506_v55  ;;  %v1519_v8 = vpack.i.bf16 %v341_v4, %v343_v5  ;;  %v1965_v20 = vperm.slane %v906_v50, %v1941_v46 }
 0x123   : > { %v1969_v51 = vperm.slane %v582_v56, %v1941_v46  ;;  %v619_v60 = vrot.slane %v1949_v54, 4  ;;  %v1976_v52 = vperm.slane %v918_v62, %v1941_v46  ;;  %v1987_v13 = vsel %vm545_vm6, %v1852_v61, %v907_v63 }
 0x124   : > { %1525 = vrot.lane.b32.xlu2 %v1524_v6, %s1694_s15  ;;  %1555 = vrot.lane.b32.xlu1 %v1554_v7, %s1694_s15  ;;  %v1696_v6 = vmov 1934713408   ;;  %v769_v7 = vrot.slane %v1836_v53, 4 }
 0x125   : > { %1520 = vrot.lane.b32.xlu0 %v1519_v8, %s1693_s14  ;;  %v598_v21 = vunpack.c.l.s4 %v1696_v6  ;;  %v1973_v8 = vperm.slane %v584_v59, %v1941_v46  ;;  %v620_v25 = vsel %vm545_vm6, %v1969_v51, %v619_v60 }
 0x126   : > { %v2002_v24 = vsel %vm545_vm6, %v769_v7, %v1863_v3 }
 0x127   : > { %v629_v23 = vrot.slane %v1973_v8, 4 }
 0x129   : > { %v630_v44 = vsel %vm545_vm6, %v629_v23, %v1996_v22 }
 0x12c   : > { %1540 = vrot.lane.b32.xlu2 %v1539_v17, %s1694_s15  ;;  %1565 = vrot.lane.b32.xlu1 %v1564_v18, %s1694_s15  ;;  %v955_v18 = vrot.slane %v1965_v20, 4 }
 0x12d   : > { %1530 = vrot.lane.b32.xlu0 %v1539_v17, %s1693_s14  ;;  %v1990_v17 = vunpack.c.0.s8 %v598_v21 }
 0x12e   : > { %v956_v37 = vsel %vm545_vm6, %v1976_v52, %v955_v18 }
 0x12f   : > { %v2017_v36 = vperm.slane %v620_v25, %v1990_v17  ;;  %v2036_v58 = vperm.slane %v956_v37, %v1990_v17 }
 0x131   : > { %2626 = vst [vmem:[#allocation2_spill] sm:$0xff] %v2017_v36  ;;  %v645_v63 = vrot.slane %v2017_v36, 4 }
 0x132   : > { %2627 = vst [vmem:[#allocation3_spill] sm:$0xff] %v2036_v58 }
 0x134   : > { %1570 = vrot.lane.b32.xlu1 %v1569_v29, %s1694_s15  ;;  %1560 = vrot.lane.b32.xlu2 %v1559_v27, %s1693_s14 }
 0x135   : > { %1545 = vrot.lane.b32.xlu0 %v1544_v30, %s1693_s14 }
 0x13c   : > { %1575 = vrot.lane.b32.xlu2 %v1574_v32, %s1694_s15 }
 0x13d   : > { %1550 = vrot.lane.b32.xlu0 %v1549_v33, %s1693_s14  ;;  %s1393_s14 = sshll.u32 %s2660_s19, 1 }
 0x13e   : > { %s242_s15 = sadd.s32 %s1393_s14, %s2666_s18 }
 0x17e   : > { %v1526_v34 = vpop.permute.xlu2 %1525 }
 0x17f   : > { %v1528_v14 = vunpack.i.h.bf16 %v1526_v34  ;;  %v1527_v16 = vunpack.i.l.bf16 %v1526_v34 }
 0x181   : > { %v2008_v29 = vsel %vm344_vm7, 0.0, %v1528_v14  ;;  %v362_v32 = vsel %vm344_vm7, 0.0, %v1527_v16 }
 0x182   : > { %v544_v50 = vrot.slane %v2008_v29, 4  ;;  %v559_v59 = vrot.slane %v362_v32, 4 }
 0x186   : > { %v1541_v40 = vpop.permute.xlu2 %1540 }
 0x187   : > { %v1543_v48 = vunpack.i.h.bf16 %v1541_v40  ;;  %v1542_v55 = vunpack.i.l.bf16 %v1541_v40 }
 0x189   : > { %v525_v1 = vsel %vm344_vm7, 0.0, %v1543_v48  ;;  %v527_v10 = vsel %vm344_vm7, 0.0, %v1542_v55 }
 0x18a   : > { %v895_v9 = vrot.slane %v525_v1, 4  ;;  %v893_v19 = vrot.slane %v527_v10, 4 }
 0x18c   : > { %v896_v26 = vsel %vm545_vm6, %v527_v10, %v895_v9  ;;  %v894_v39 = vsel %vm545_vm6, %v893_v19, %v525_v1  ;;  %v2044_v1 = vperm.slane %v630_v44, %v1990_v17 }
 0x18d   : > { %v2023_v40 = vperm.slane %v896_v26, %v1941_v46  ;;  %v2047_v2 = vperm.slane %v894_v39, %v1941_v46 }
 0x18e   : > { %v1536_v38 = vpop.permute.xlu1 %1535  ;;  %v1561_v5 = vpop.permute.xlu2 %1560  ;;  %2628 = vst [vmem:[#allocation4_spill] sm:$0xff] %v2044_v1 }
 0x18f   : > { %v1537_v15 = vunpack.i.l.bf16 %v1536_v38  ;;  %v1538_v27 = vunpack.i.h.bf16 %v1536_v38  ;;  %v1563_v31 = vunpack.i.h.bf16 %v1561_v5  ;;  %v1562_v33 = vunpack.i.l.bf16 %v1561_v5 }
 0x190   : > { %v941_v21 = vrot.slane %v2023_v40, 4 }
 0x191   : > { %v542_v30 = vsel %vm365_vm8, 0.0, %v1537_v15  ;;  %v540_v45 = vsel %vm365_vm8, 0.0, %v1538_v27  ;;  %v2033_v55 = vsel %vm365_vm8, 0.0, %v1563_v31  ;;  %v2040_v62 = vsel %vm365_vm8, 0.0, %v1562_v33 }
 0x192   : > { %v993_v47 = vrot.slane %v542_v30, 4  ;;  %v995_v38 = vrot.slane %v540_v45, 4  ;;  %v807_v60 = vrot.slane %v2033_v55, 4  ;;  %v795_v10 = vrot.slane %v2040_v62, 4 }
 0x194   : > { %v994_v7 = vsel %vm545_vm6, %v993_v47, %v540_v45  ;;  %v996_v26 = vsel %vm545_vm6, %v542_v30, %v995_v38 }
 0x195   : > { %v2069_v27 = vperm.slane %v994_v7, %v1941_v46 }
 0x196   : > { %v1556_v34 = vpop.permute.xlu1 %1555  ;;  %v2014_v35 = vpop.permute.xlu2 %1575 }
 0x197   : > { %v1558_v41 = vunpack.i.h.bf16 %v1556_v34  ;;  %v1521_v43 = vpop.permute.xlu0 %1520  ;;  %v1578_v49 = vunpack.i.h.bf16 %v2014_v35  ;;  %v1557_v56 = vunpack.i.l.bf16 %v1556_v34  ;;  %v2074_v34 = vperm.slane %v1987_v13, %v1941_v46 }
 0x198   : > { %v1522_v48 = vunpack.i.l.bf16 %v1521_v43  ;;  %v1523_v14 = vunpack.i.h.bf16 %v1521_v43  ;;  %v1577_v39 = vunpack.i.l.bf16 %v2014_v35  ;;  %v965_v43 = vrot.slane %v1983_v12, 4 }
 0x199   : > { %v364_v5 = vsel %vm344_vm7, 0.0, %v1558_v41  ;;  %v361_v6 = vsel %vm344_vm7, 0.0, %v1578_v49  ;;  %v526_v11 = vsel %vm344_vm7, 0.0, %v1557_v56 }
 0x19a   : > { %v2058_v9 = vsel %vm365_vm8, 0.0, %v1522_v48  ;;  %v557_v16 = vrot.slane %v364_v5, 4  ;;  %v560_v18 = vsel %vm545_vm6, %v364_v5, %v559_v59  ;;  %v546_v19 = vsel %vm545_vm6, %v544_v50, %v361_v6 }
 0x19b   : > { %v669_v31 = vrot.slane %v2058_v9, 4  ;;  %v881_v37 = vrot.slane %v526_v11, 4  ;;  %v2079_v44 = vperm.slane %v560_v18, %v1941_v46  ;;  %v2083_v30 = vsel %vm365_vm8, 0.0, %v1523_v14 }
 0x19c   : > { %v2086_v45 = vperm.slane %v546_v19, %v1941_v46  ;;  %v558_v13 = vsel %vm545_vm6, %v557_v16, %v362_v32  ;;  %v547_v48 = vrot.slane %v361_v6, 4  ;;  %v2092_v50 = vperm.slane %v996_v26, %v1941_v46 }
 0x19d   : > { %v670_v59 = vsel %vm545_vm6, %v669_v31, %v2083_v30  ;;  %v2103_v14 = vperm.slane %v558_v13, %v1941_v46  ;;  %v966_v18 = vsel %vm545_vm6, %v965_v43, %v2074_v34  ;;  %v605_v26 = vrot.slane %v2079_v44, 4 }
 0x19e   : > { %v1566_v25 = vpop.permute.xlu1 %1565  ;;  %v595_v16 = vrot.slane %v2086_v45, 4  ;;  %v548_v31 = vsel %vm545_vm6, %v2008_v29, %v547_v48 }
 0x19f   : > { %v1531_v33 = vpop.permute.xlu0 %1530  ;;  %v1567_v41 = vunpack.i.l.bf16 %v1566_v25  ;;  %v1568_v13 = vunpack.i.h.bf16 %v1566_v25  ;;  %v2126_v19 = vperm.slane %v548_v31, %v1941_v46 }
 0x1a0   : > { %v1533_v47 = vunpack.i.h.bf16 %v1531_v33  ;;  %v1532_v49 = vunpack.i.l.bf16 %v1531_v33  ;;  %v2114_v33 = vsel %vm344_vm7, 0.0, %v1577_v39  ;;  %v596_v25 = vsel %vm545_vm6, %v2103_v14, %v595_v16 }
 0x1a1   : > { %v524_v35 = vsel %vm344_vm7, 0.0, %v1567_v41  ;;  %v2169_v39 = vperm.slane %v966_v18, %v1990_v17 }
 0x1a2   : > { %v541_v38 = vsel %vm365_vm8, 0.0, %v1533_v47  ;;  %v882_v5 = vsel %vm545_vm6, %v881_v37, %v524_v35  ;;  %v883_v7 = vrot.slane %v524_v35, 4  ;;  %v543_v6 = vsel %vm365_vm8, 0.0, %v1532_v49 }
 0x1a3   : > { %v1007_v32 = vrot.slane %v541_v38, 4  ;;  %v1005_v37 = vrot.slane %v543_v6, 4  ;;  %v2117_v47 = vperm.slane %v670_v59, %v1941_v46  ;;  %v2120_v35 = vperm.slane %v882_v5, %v1941_v46  ;;  %2630 = vst [vmem:[#allocation6_spill] sm:$0xff] %v2169_v39 }
 0x1a4   : > { %v884_v61 = vsel %vm545_vm6, %v526_v11, %v883_v7 }
 0x1a5   : > { %v1008_v28 = vsel %vm545_vm6, %v543_v6, %v1007_v32  ;;  %v1006_v59 = vsel %vm545_vm6, %v1005_v37, %v541_v38  ;;  %v2141_v32 = vsel %vm344_vm7, 0.0, %v1568_v13  ;;  %v2144_v6 = vperm.slane %v884_v61, %v1941_v46 }
 0x1a6   : > { %v1571_v41 = vpop.permute.xlu1 %1570  ;;  %v2147_v16 = vperm.slane %v1008_v28, %v1941_v46  ;;  %v705_v31 = vrot.slane %v2117_v47, 4  ;;  %v931_v37 = vrot.slane %v2120_v35, 4 }
 0x1a7   : > { %v1546_v43 = vpop.permute.xlu0 %1545  ;;  %v1572_v49 = vunpack.i.l.bf16 %v1571_v41  ;;  %v1573_v56 = vunpack.i.h.bf16 %v1571_v41 }
 0x1a8   : > { %v1548_v29 = vunpack.i.h.bf16 %v1546_v43  ;;  %v1547_v48 = vunpack.i.l.bf16 %v1546_v43  ;;  %v2152_v43 = vperm.slane %v596_v25, %v1990_v17  ;;  %v606_v25 = vsel %vm545_vm6, %v605_v26, %v2126_v19 }
 0x1a9   : > { %v2137_v7 = vsel %vm344_vm7, 0.0, %v1572_v49  ;;  %v2155_v49 = vperm.slane %v1006_v59, %v1941_v46  ;;  %v2161_v61 = vsel %vm344_vm7, 0.0, %v1573_v56 }
 0x1aa   : > { %v466_v5 = vsel %vm365_vm8, 0.0, %v1548_v29  ;;  %v465_v11 = vsel %vm365_vm8, 0.0, %v1547_v48  ;;  %2629 = vst [vmem:[#allocation5_spill] sm:$0xff] %v2152_v43  ;;  %v693_v28 = vrot.slane %v2137_v7, 4  ;;  %v607_v29 = vrot.slane %v2126_v19, 4 }
 0x1ab   : > { %v793_v38 = vrot.slane %v465_v11, 4  ;;  %v805_v41 = vrot.slane %v466_v5, 4  ;;  %v681_v48 = vrot.slane %v2141_v32, 4  ;;  %v808_v56 = vsel %vm545_vm6, %v466_v5, %v807_v60 }
 0x1ac   : > { %v694_v23 = vsel %vm545_vm6, %v693_v28, %v2114_v33  ;;  %v646_v26 = vsel %vm545_vm6, %v645_v63, %v2152_v43  ;;  %v796_v5 = vsel %vm545_vm6, %v465_v11, %v795_v10  ;;  %v932_v28 = vsel %vm545_vm6, %v2047_v2, %v931_v37 }
 0x1ad   : > { %v794_v13 = vsel %vm545_vm6, %v793_v38, %v2040_v62  ;;  %v806_v19 = vsel %vm545_vm6, %v805_v41, %v2033_v55  ;;  %v682_v18 = vsel %vm545_vm6, %v681_v48, %v2161_v61  ;;  %v2197_v55 = vperm.slane %v808_v56, %v1941_v46 }
 0x1ae   : > { %v2179_v15 = vperm.slane %v794_v13, %v1941_v46  ;;  %v700_v13 = vperm.slane %v694_v23, %v1941_v46  ;;  %v2200_v41 = vperm.slane %v932_v28, %v1990_v17  ;;  %v2203_v63 = vperm.slane %v806_v19, %v1941_v46 }
 0x1af   : > { %v1551_v4 = vpop.permute.xlu0 %1550  ;;  %v688_v62 = vperm.slane %v682_v18, %v1941_v46  ;;  %v942_v10 = vsel %vm545_vm6, %v941_v21, %v2144_v6  ;;  %v2631_v37 = vrot.slane %v2036_v58, 4  ;;  %v985_v19 = vrot.slane %v2169_v39, 4 }
 0x1b0   : > { %v1553_v48 = vunpack.i.h.bf16 %v1551_v4  ;;  %v1552_v38 = vunpack.i.l.bf16 %v1551_v4  ;;  %v729_v23 = vrot.slane %v700_v13, 4  ;;  %v843_v11 = vrot.slane %v2179_v15, 4 }
 0x1b1   : > { %v982_v56 = vsel %vm545_vm6, %v2631_v37, %v2200_v41  ;;  %v2222_v60 = vperm.slane %v606_v25, %v1990_v17  ;;  %v2225_v21 = vperm.slane %v942_v10, %v1990_v17  ;;  %v2241_v25 = vperm.slane %v796_v5, %v1941_v46 }
 0x1b2   : > { %v2217_v4 = vsel %vm365_vm8, 0.0, %v1552_v38  ;;  %v1579_v18 = vpack.i.bf16 %v646_v26, %v982_v56  ;;  %v2229_v59 = vsel %vm365_vm8, 0.0, %v1553_v48  ;;  %v730_v37 = vsel %vm545_vm6, %v729_v23, %v688_v62 }
 0x1b3   : > { %v657_v28 = vrot.slane %v2217_v4, 4  ;;  %2632 = vst [vmem:[#allocation7_spill] sm:$0xff] %v2225_v21  ;;  %v2234_v38 = vperm.slane %v2002_v24, %v1941_v46  ;;  %v2633_v26 = vrot.slane %v1841_v57, 4  ;;  %v853_v10 = vrot.slane %v2197_v55, 4 }
 0x1b4   : > { %v731_v39 = vrot.slane %v688_v62, 4  ;;  %1580 = vrot.lane.b32.xlu1 %v1579_v18, %s1697_s16  ;;  %v986_v48 = vsel %vm545_vm6, %v985_v19, %v2225_v21  ;;  %v841_v5 = vrot.slane %v2203_v63, 4  ;;  %v2634_v62 = vrot.slane %v2044_v1, 4 }
 0x1b5   : > { %v782_v56 = vsel %vm545_vm6, %v2633_v26, %v1856_v0  ;;  %v658_v42 = vsel %vm545_vm6, %v657_v28, %v2229_v59  ;;  %v819_v26 = vrot.slane %v2234_v38, 4  ;;  %v2258_v18 = vperm.slane %v730_v37, %v1990_v17 }
 0x1b6   : > { %v664_v24 = vperm.slane %v658_v42, %v1941_v46  ;;  %v788_v23 = vperm.slane %v782_v56, %v1941_v46  ;;  %v650_v36 = vsel %vm545_vm6, %v2634_v62, %v2222_v60  ;;  %v844_v28 = vsel %vm545_vm6, %v2203_v63, %v843_v11 }
 0x1b7   : > { %v2265_v21 = vperm.slane %v844_v28, %v1990_v17  ;;  %v1584_v58 = vpack.i.bf16 %v650_v36, %v986_v48  ;;  %v2635_v62 = vrot.slane %v2069_v27, 4  ;;  %v732_v1 = vsel %vm545_vm6, %v700_v13, %v731_v39 }
 0x1b8   : > { %v707_v42 = vrot.slane %v664_v24, 4  ;;  %v706_v19 = vsel %vm545_vm6, %v705_v31, %v664_v24  ;;  %v820_v56 = vsel %vm545_vm6, %v788_v23, %v819_v26  ;;  %v608_v11 = vsel %vm545_vm6, %v2079_v44, %v607_v29 }
 0x1b9   : > { %v2268_v43 = vperm.slane %v706_v19, %v1990_v17  ;;  %v1020_v37 = vsel %vm545_vm6, %v2155_v49, %v2635_v62  ;;  %v869_v63 = vrot.slane %v2265_v21, 4  ;;  %v2636_v36 = vrot.slane %v1996_v22, 4 }
 0x1ba   : > { %v708_v31 = vsel %vm545_vm6, %v2117_v47, %v707_v42  ;;  %v2286_v26 = vperm.slane %v820_v56, %v1990_v17  ;;  %v2295_v47 = vperm.slane %v1020_v37, %v1990_v17  ;;  %v2298_v44 = vperm.slane %v732_v1, %v1990_v17 }
 0x1bb   : > { %v632_v24 = vsel %vm545_vm6, %v1973_v8, %v2636_v36  ;;  %v755_v48 = vrot.slane %v2268_v43, 4  ;;  %v2289_v39 = vperm.slane %v708_v31, %v1990_v17  ;;  %v2637_v22 = vrot.slane %v2144_v6, 4 }
 0x1bc   : > { %v2292_v13 = vperm.slane %v632_v24, %v1990_v17  ;;  %v967_v29 = vrot.slane %v2074_v34, 4  ;;  %1585 = vrot.lane.b32.xlu1 %v1584_v58, %s1698_s17  ;;  %v870_v42 = vsel %vm545_vm6, %v869_v63, %v2286_v26  ;;  %v2312_v1 = vperm.slane %v608_v11, %v1990_v17 }
 0x1bd   : > { %v944_v8 = vsel %vm545_vm6, %v2023_v40, %v2637_v22  ;;  %v756_v28 = vsel %vm545_vm6, %v2258_v18, %v755_v48  ;;  %v759_v19 = vrot.slane %v2289_v39, 4  ;;  %v2638_v58 = vrot.slane %v1863_v3, 4 }
 0x1be   : > { %1056 = vrot.lane.b32.xlu2 %v756_v28, %s1692_s13  ;;  %v653_v40 = vrot.slane %v2292_v13, 4  ;;  %v968_v34 = vsel %vm545_vm6, %v1983_v12, %v967_v29  ;;  %v2639_v56 = vrot.slane %v1856_v0, 4  ;;  %v2329_v63 = vperm.slane %v944_v8, %v1990_v17 }
 0x1bf   : > { %v772_v6 = vsel %vm545_vm6, %v1836_v53, %v2638_v58  ;;  %v760_v37 = vsel %vm545_vm6, %v2298_v44, %v759_v19  ;;  %v2332_v31 = vperm.slane %v968_v34, %v1990_v17  ;;  %v1599_v3 = vpack.i.bf16 %v870_v42, %v2295_v47 }
 0x1c0   : > { %v784_v62 = vsel %vm545_vm6, %v1841_v57, %v2639_v56  ;;  %1096 = vrot.lane.b32.xlu0 %v760_v37, %s1699_s25  ;;  %v2640_v53 = vrot.slane %v2147_v16, 4  ;;  %v817_v0 = vrot.slane %v788_v23, 4  ;;  %v842_v11 = vsel %vm545_vm6, %v841_v5, %v2179_v15 }
 0x1c1   : > { %v2335_v12 = vperm.slane %v784_v62, %v1941_v46  ;;  %v989_v36 = vrot.slane %v2332_v31, 4  ;;  %v780_v24 = vperm.slane %v772_v6, %v1941_v46  ;;  %v854_v22 = vsel %vm545_vm6, %v853_v10, %v2241_v25 }
 0x1c2   : > { %v1030_v57 = vsel %vm545_vm6, %v2640_v53, %v2092_v50  ;;  %v654_v8 = vsel %vm545_vm6, %v653_v40, %v2312_v1  ;;  %v818_v23 = vsel %vm545_vm6, %v817_v0, %v2234_v38  ;;  %v2641_v15 = vrot.slane %v2155_v49, 4 }
 0x1c3   : > { %v829_v48 = vrot.slane %v2335_v12, 4  ;;  %v2353_v29 = vperm.slane %v1030_v57, %v1990_v17  ;;  %v990_v28 = vsel %vm545_vm6, %v989_v36, %v2329_v63  ;;  %v2365_v10 = vperm.slane %v818_v23, %v1990_v17 }
 0x1c4   : > { %v1018_v5 = vsel %vm545_vm6, %v2641_v15, %v2069_v27  ;;  %v2368_v19 = vperm.slane %v842_v11, %v1990_v17  ;;  %v1589_v40 = vpack.i.bf16 %v654_v8, %v990_v28  ;;  %v860_v38 = vperm.slane %v854_v22, %v1990_v17  ;;  %1600 = vrot.lane.b32.xlu1 %v1599_v3, %s1697_s16 }
 0x1c5   : > { %v830_v42 = vsel %vm545_vm6, %v829_v48, %v780_v24  ;;  %v2373_v49 = vperm.slane %v1018_v5, %v1990_v17  ;;  %v929_v27 = vrot.slane %v2047_v2, 4  ;;  %v855_v58 = vrot.slane %v2241_v25, 4 }
 0x1c6   : > { %v836_v34 = vperm.slane %v830_v42, %v1990_v17  ;;  %v867_v6 = vrot.slane %v2365_v10, 4  ;;  %v871_v56 = vrot.slane %v2286_v26, 4  ;;  %1590 = vrot.lane.b32.xlu2 %v1589_v40, %s1700_s26  ;;  %v1045_v37 = vrot.slane %v2353_v29, 4 }
 0x1c7   : > { %v1041_v53 = vrot.slane %v2373_v49, 4  ;;  %v1043_v57 = vrot.slane %v2295_v47, 4  ;;  %v930_v2 = vsel %vm545_vm6, %v929_v27, %v2120_v35  ;;  %v2642_v3 = vrot.slane %v2103_v14, 4 }
 0x1c8   : > { %v875_v62 = vrot.slane %v836_v34, 4  ;;  %v868_v25 = vsel %vm545_vm6, %v2368_v19, %v867_v6  ;;  %v617_v36 = vrot.slane %v1969_v51, 4  ;;  %v856_v47 = vsel %vm545_vm6, %v2197_v55, %v855_v58 }
 0x1c9   : > { %v594_v26 = vsel %vm545_vm6, %v2642_v3, %v2086_v45  ;;  %v1042_v11 = vsel %vm545_vm6, 0.0, %v1041_v53  ;;  %v872_v35 = vsel %vm545_vm6, %v2265_v21, %v871_v56  ;;  %v1046_v22 = vsel %vm545_vm6, 0.0, %v1045_v37 }
 0x1ca   : > { %v876_v0 = vsel %vm545_vm6, %v860_v38, %v875_v62  ;;  %v1594_v48 = vpack.i.bf16 %v868_v25, %v1042_v11  ;;  %v1044_v8 = vsel %vm545_vm6, 0.0, %v1043_v57  ;;  %v873_v14 = vrot.slane %v860_v38, 4 }
 0x1cb   : > { %v2402_v45 = vperm.slane %v930_v2, %v1990_v17  ;;  %v1614_v23 = vpack.i.bf16 %v876_v0, %v1046_v22  ;;  %v600_v51 = vperm.slane %v594_v26, %v1990_v17  ;;  %v953_v15 = vrot.slane %v1976_v52, 4 }
 0x1cc   : > { %1595 = vrot.lane.b32.xlu0 %v1594_v48, %s1692_s13  ;;  %v831_v55 = vrot.slane %v780_v24, 4  ;;  %v1031_v5 = vrot.slane %v2092_v50, 4  ;;  %v683_v21 = vrot.slane %v2161_v61, 4  ;;  %v1604_v28 = vpack.i.bf16 %v872_v35, %v1044_v8 }
 0x1cd   : > { %v618_v42 = vsel %vm545_vm6, %v617_v36, %v1949_v54  ;;  %v695_v40 = vrot.slane %v2114_v33, 4  ;;  %v659_v38 = vrot.slane %v2229_v59, 4  ;;  %1615 = vrot.lane.b32.xlu1 %v1614_v23, %s1701_s27  ;;  %v954_v27 = vsel %vm545_vm6, %v953_v15, %v1965_v20 }
 0x1ce   : > { %v979_v52 = vrot.slane %v2402_v45, 4  ;;  %v671_v50 = vrot.slane %v2083_v30, 4  ;;  %1605 = vrot.lane.b32.xlu2 %v1604_v28, %s1699_s25  ;;  %v874_v61 = vsel %vm545_vm6, %v873_v14, %v836_v34  ;;  %v832_v54 = vsel %vm545_vm6, %v2335_v12, %v831_v55 }
 0x1cf   : > { %v864_v33 = vperm.slane %v856_v47, %v1990_v17  ;;  %v696_v59 = vsel %vm545_vm6, %v2137_v7, %v695_v40  ;;  %v624_v24 = vperm.slane %v618_v42, %v1990_v17  ;;  %v643_v58 = vrot.slane %v600_v51, 4 }
 0x1d0   : > { %v960_v20 = vperm.slane %v954_v27, %v1990_v17  ;;  %v684_v30 = vsel %vm545_vm6, %v2141_v32, %v683_v21  ;;  %v1032_v6 = vsel %vm545_vm6, %v2147_v16, %v1031_v5  ;;  %v660_v34 = vsel %vm545_vm6, %v2217_v4, %v659_v38 }
 0x1d1   : > { %v1609_v12 = vpack.i.bf16 %v874_v61, %v2353_v29  ;;  %v840_v7 = vperm.slane %v832_v54, %v1990_v17  ;;  %v672_v62 = vsel %vm545_vm6, %v2058_v9, %v671_v50  ;;  %v704_v37 = vperm.slane %v696_v59, %v1941_v46  ;;  %v2645_v50 = vld [vmem:[#allocation2_spill] sm:$0xff] }
 0x1d2   : > { %v980_v56 = vsel %vm545_vm6, %v960_v20, %v979_v52  ;;  %v757_v53 = vrot.slane %v2298_v44, 4  ;;  %v877_v32 = vrot.slane %v864_v33, 4  ;;  %v692_v57 = vperm.slane %v684_v30, %v1941_v46 }
 0x1d3   : > { %v641_v16 = vrot.slane %v624_v24, 4  ;;  %v644_v4 = vsel %vm545_vm6, %v624_v24, %v643_v58  ;;  %v1040_v29 = vperm.slane %v1032_v6, %v1990_v17  ;;  %v668_v2 = vperm.slane %v660_v34, %v1941_v46  ;;  %v2646_v24 = vld [vmem:[#allocation7_spill] sm:$0xff] }
 0x1d4   : > { %1610 = vrot.lane.b32.xlu0 %v1609_v12, %s1698_s17  ;;  %v758_v25 = vsel %vm545_vm6, %v757_v53, %v2289_v39  ;;  %v1619_v9 = vpack.i.bf16 %v644_v4, %v980_v56  ;;  %v991_v3 = vrot.slane %v2329_v63, 4  ;;  %v753_v44 = vrot.slane %v2258_v18, 4  ;;  %v2647_v12 = vld [vmem:[#allocation6_spill] sm:$0xff] }
 0x1d5   : > { %v865_v26 = vrot.slane %v2368_v19, 4  ;;  %1076 = vrot.lane.b32.xlu1 %v758_v25, %s1697_s16  ;;  %v977_v0 = vrot.slane %v960_v20, 4  ;;  %v879_v11 = vrot.slane %v840_v7, 4  ;;  %v655_v36 = vrot.slane %v2312_v1, 4  ;;  %s1394_s16 = sshll.u32 %s242_s15, 3 }
 0x1d6   : > { %1620 = vrot.lane.b32.xlu2 %v1619_v9, %s1692_s13  ;;  %v878_v47 = vsel %vm545_vm6, %v877_v32, %v840_v7  ;;  %v743_v48 = vrot.slane %v692_v57, 4  ;;  %v1047_v35 = vrot.slane %v1040_v29, 4  ;;  %v2456_v39 = vsel %vm545_vm6, %v753_v44, %v2268_v43 }
 0x1d7   : > { %v2459_v18 = vsel %vm545_vm6, %v641_v16, %v600_v51  ;;  %v680_v63 = vperm.slane %v672_v62, %v1941_v46  ;;  %v741_v19 = vrot.slane %v704_v37, 4  ;;  %v719_v22 = vrot.slane %v668_v2, 4 }
 0x1d8   : > { %v992_v8 = vsel %vm545_vm6, %v2332_v31, %v991_v3  ;;  %v1624_v14 = vpack.i.bf16 %v878_v47, %v1040_v29  ;;  %v880_v1 = vsel %vm545_vm6, %v864_v33, %v879_v11  ;;  %v2467_v23 = vsel %vm545_vm6, %v977_v0, %v2402_v45  ;;  %v2643_v45 = vld [vmem:[#allocation5_spill] sm:$0xff] }
 0x1d9   : > { %v2471_v43 = vsel %vm545_vm6, %v865_v26, %v2365_v10  ;;  %v656_v51 = vsel %vm545_vm6, %v2292_v13, %v655_v36  ;;  %v983_v46 = vrot.slane %v2200_v41, 4  ;;  %v1048_v31 = vsel %vm545_vm6, 0.0, %v1047_v35  ;;  %v2644_v13 = vld [vmem:[#allocation3_spill] sm:$0xff] }
 0x1da   : > { %v1644_v15 = vpack.i.bf16 %v656_v51, %v992_v8  ;;  %v744_v55 = vsel %vm545_vm6, %v704_v37, %v743_v48  ;;  %v717_v5 = vrot.slane %v680_v63, 4  ;;  %v1629_v21 = vpack.i.bf16 %v880_v1, %v1048_v31  ;;  %v1236_v51 = vld [vmem:[%s2611_s2] sm:$0xff] }
 0x1db   : > { %v647_v28 = vrot.slane %v2643_v45, 4  ;;  %v742_v42 = vsel %vm545_vm6, %v741_v19, %v692_v57  ;;  %v720_v10 = vsel %vm545_vm6, %v680_v63, %v719_v22  ;;  %v752_v41 = vperm.slane %v744_v55, %v1990_v17 }
 0x1dc   : > { %1625 = vrot.lane.b32.xlu0 %v1624_v14, %s1700_s26  ;;  %v984_v40 = vsel %vm545_vm6, %v2644_v13, %v983_v46  ;;  %v718_v38 = vsel %vm545_vm6, %v717_v5, %v668_v2  ;;  %v748_v27 = vperm.slane %v742_v42, %v1990_v17  ;;  %v728_v52 = vperm.slane %v720_v10, %v1990_v17  ;;  %v1237_v46 = vld [vmem:[%s2611_s2 + $0x8] sm:$0xff] }
 0x1dd   : > { %1645 = vrot.lane.b32.xlu1 %v1644_v15, %s1702_s28  ;;  %v648_v61 = vsel %vm545_vm6, %v2645_v50, %v647_v28  ;;  %v724_v33 = vperm.slane %v718_v38, %v1990_v17  ;;  %v765_v59 = vrot.slane %v752_v41, 4  ;;  %v987_v58 = vrot.slane %v2646_v24, 4  ;;  %v2648_v17 = vld [vmem:[#allocation4_spill] sm:$0xff] }
 0x1de   : > { %1630 = vrot.lane.b32.xlu2 %v1629_v21, %s1702_s28  ;;  %v1634_v54 = vpack.i.bf16 %v648_v61, %v984_v40  ;;  %v761_v20 = vrot.slane %v748_v27, 4  ;;  %v651_v6 = vrot.slane %v2222_v60, 4  ;;  %v767_v37 = vrot.slane %v728_v52, 4 }
 0x1df   : > { %v766_v30 = vsel %vm545_vm6, %v765_v59, %v728_v52  ;;  %v988_v56 = vsel %vm545_vm6, %v2647_v12, %v987_v58  ;;  %v763_v60 = vrot.slane %v724_v33, 4  ;;  %v1703_v55 = vmov 0  }
 0x1e0   : > { %v762_v34 = vsel %vm545_vm6, %v761_v20, %v724_v33  ;;  %v652_v7 = vsel %vm545_vm6, %v2648_v17, %v651_v6  ;;  %v768_v53 = vsel %vm545_vm6, %v752_v41, %v767_v37  ;;  %1649 = vset.pattern.permute.xlu0 %v1703_v55  ;;  %1650 = vset.pattern.permute.xlu1 %v1703_v55 }
 0x1e1   : > { %v1639_v62 = vpack.i.bf16 %v652_v7, %v988_v56  ;;  %v764_v32 = vsel %vm545_vm6, %v748_v27, %v763_v60  ;;  %1651 = vset.pattern.permute.xlu2 %v1703_v55 }
 0x1e4   : > { %1635 = vrot.lane.b32.xlu0 %v1634_v54, %s1699_s25 }
 0x1e5   : > { %1156 = vrot.lane.b32.xlu1 %v766_v30, %s1700_s26  ;;  %s244_s26 = scalar_lea.vmem %s2614_s5, %s1394_s16 }
 0x1e6   : > { %1116 = vrot.lane.b32.xlu2 %v762_v34, %s1698_s17 }
 0x1ec   : > { %1640 = vrot.lane.b32.xlu0 %v1639_v62, %s1701_s27 }
 0x1ed   : > { %1245 = vperm.xlu1 %1650, %v1237_v46  }
 0x1ee   : > { %1176 = vrot.lane.b32.xlu2 %v768_v53, %s1702_s28 }
 0x1f4   : > { %1136 = vrot.lane.b32.xlu0 %v764_v32, %s1701_s27 }
 0x1fc   : > { %1240 = vperm.xlu0 %1649, %v1236_v51  }
 0x218   : > { %v2506_v57 = vpop.permute.xlu2 %1056 }
 0x219   : > { %v1191_v17 = vsel %vm1189_vm9, %v2456_v39, %v2506_v57 }
 0x220   : > { %v2510_v4 = vpop.permute.xlu2 %1590 }
 0x226   : > { %v2508_v16 = vpop.permute.xlu1 %1580 }
 0x227   : > { %v1582_v59 = vunpack.i.l.bf16 %v2508_v16  ;;  %v1583_v20 = vunpack.i.h.bf16 %v2508_v16 }
 0x228   : > { %v1606_v25 = vpop.permute.xlu2 %1605 }
 0x229   : > { %v1607_v63 = vunpack.i.l.bf16 %v1606_v25  ;;  %v1608_v61 = vunpack.i.h.bf16 %v1606_v25 }
 0x22e   : > { %v2514_v2 = vpop.permute.xlu1 %1585 }
 0x22f   : > { %v1587_v7 = vunpack.i.l.bf16 %v2514_v2 }
 0x230   : > { %v1621_v26 = vpop.permute.xlu2 %1620 }
 0x231   : > { %v1622_v10 = vunpack.i.l.bf16 %v1621_v26  ;;  %v1623_v27 = vunpack.i.h.bf16 %v1621_v26 }
 0x232   : > { %v2512_v29 = vpop.permute.xlu0 %1096 }
 0x233   : > { %v1193_v54 = vsel %vm1189_vm9, %v2467_v23, %v1622_v10  ;;  %v1190_v24 = vsel %vm1189_vm9, %v2459_v18, %v1623_v27  ;;  %v1592_v18 = vunpack.i.l.bf16 %v2510_v4  ;;  %v1277_v27 = vld [vmem:[%s2612_s3] sm:$0xf] }
 0x234   : > { %v1199_v34 = vsel %vm1195_vm10, %v1193_v54, %v1582_v59  ;;  %v1196_v37 = vsel %vm1195_vm10, %v1190_v24, %v1583_v20 }
 0x236   : > { %v1601_v3 = vpop.permute.xlu1 %1600 }
 0x237   : > { %v1602_v36 = vunpack.i.l.bf16 %v1601_v3  ;;  %v1603_v40 = vunpack.i.h.bf16 %v1601_v3 }
 0x238   : > { %v2522_v22 = vpop.permute.xlu2 %1630 }
 0x239   : > { %v1632_v15 = vunpack.i.l.bf16 %v2522_v22 }
 0x23e   : > { %v1596_v9 = vpop.permute.xlu0 %1595 }
 0x23f   : > { %v1597_v44 = vunpack.i.l.bf16 %v1596_v9  ;;  %v2518_v47 = vpop.permute.xlu1 %1615  ;;  %v1598_v5 = vunpack.i.h.bf16 %v1596_v9  ;;  %v1588_v9 = vunpack.i.h.bf16 %v2514_v2 }
 0x240   : > { %v1618_v12 = vunpack.i.h.bf16 %v2518_v47  ;;  %v1117_v62 = vpop.permute.xlu2 %1116 }
 0x241   : > { %v1194_v0 = vsel %vm1189_vm9, %v2373_v49, %v1597_v44  ;;  %v1617_v49 = vunpack.i.l.bf16 %v2518_v47  ;;  %v1192_v41 = vsel %vm1189_vm9, %v2471_v43, %v1598_v5  ;;  %v1633_v44 = vunpack.i.h.bf16 %v2522_v22  ;;  %v1279_v5 = vld [vmem:[%s2613_s4] sm:$0xff] }
 0x242   : > { %v1200_v35 = vsel %vm1195_vm10, %v1194_v0, %v1602_v36  ;;  %v1198_v50 = vsel %vm1195_vm10, %v1192_v41, %v1603_v40  ;;  %1282 = vperm.xlu2 %1651, %v1279_v5  }
 0x243   : > { %v1206_v19 = vsel %vm1201_vm11, %v1200_v35, %v1607_v63  ;;  %v1204_v43 = vsel %vm1201_vm11, %v1198_v50, %v1608_v61  ;;  %v1593_v63 = vunpack.i.h.bf16 %v2510_v4  ;;  %v1406_v4 = vld [vmem:[%s2610_s1] sm:$0xff] }
 0x246   : > { %v1611_v11 = vpop.permute.xlu0 %1610 }
 0x247   : > { %v1612_v48 = vunpack.i.l.bf16 %v1611_v11  ;;  %v1077_v28 = vpop.permute.xlu1 %1076  ;;  %v1613_v52 = vunpack.i.h.bf16 %v1611_v11 }
 0x248   : > { %v1197_v3 = vsel %vm1195_vm10, %v1191_v17, %v1077_v28 }
 0x249   : > { %v1212_v8 = vsel %vm1207_vm12, %v1206_v19, %v1612_v48  ;;  %v1210_v30 = vsel %vm1207_vm12, %v1204_v43, %v1613_v52  ;;  %v1203_v47 = vsel %vm1201_vm11, %v1197_v3, %v2512_v29  ;;  %v1177_v29 = vpop.permute.xlu2 %1176 }
 0x24a   : > { %v1218_v31 = vsel %vm1213_vm13, %v1212_v8, %v1617_v49  ;;  %v1216_v25 = vsel %vm1213_vm13, %v1210_v30, %v1618_v12  ;;  %v1209_v22 = vsel %vm1207_vm12, %v1203_v47, %v1117_v62 }
 0x24e   : > { %v1626_v14 = vpop.permute.xlu0 %1625 }
 0x24f   : > { %v1627_v1 = vunpack.i.l.bf16 %v1626_v14  ;;  %v1628_v6 = vunpack.i.h.bf16 %v1626_v14  ;;  %v1646_v56 = vpop.permute.xlu1 %1645 }
 0x250   : > { %v1647_v26 = vunpack.i.l.bf16 %v1646_v56  ;;  %v1648_v14 = vunpack.i.h.bf16 %v1646_v56 }
 0x251   : > { %v1224_v21 = vsel %vm1219_vm14, %v1218_v31, %v1627_v1  ;;  %v1222_v57 = vsel %vm1219_vm14, %v1216_v25, %v1628_v6 }
 0x252   : > { %v1230_v45 = vsel %vm1225_vm15, %v1224_v21, %v1632_v15  ;;  %v1228_v48 = vsel %vm1225_vm15, %v1222_v57, %v1633_v44 }
 0x253   : > { %v1233_v42 = vpack.c.bf16 %v1230_v45, %v1230_v45 }
 0x255   : > { %v1259_v13 = vsel %vm1257_vm0, %v1233_v42, 0 }
 0x256   : > { %v1636_v38 = vpop.permute.xlu0 %1635  ;;  %1266 = vmatpush.bf16.msra.mxu0 %v1259_v13 }
 0x257   : > { %v1637_v33 = vunpack.i.l.bf16 %v1636_v38  ;;  %v1638_v58 = vunpack.i.h.bf16 %v1636_v38  ;;  %v1157_v1 = vpop.permute.xlu1 %1156 }
 0x259   : > { %v1205_v23 = vsel %vm1201_vm11, %v1199_v34, %v1637_v33  ;;  %v1202_v60 = vsel %vm1201_vm11, %v1196_v37, %v1638_v58 }
 0x25a   : > { %v1211_v39 = vsel %vm1207_vm12, %v1205_v23, %v1587_v7  ;;  %v1208_v11 = vsel %vm1207_vm12, %v1202_v60, %v1588_v9 }
 0x25e   : > { %v1641_v53 = vpop.permute.xlu0 %1640 }
 0x25f   : > { %v1643_v32 = vunpack.i.h.bf16 %v1641_v53  ;;  %v1642_v16 = vunpack.i.l.bf16 %v1641_v53  ;;  %v1246_v28 = vpop.permute.xlu1 %1245 }
 0x261   : > { %v1217_v0 = vsel %vm1213_vm13, %v1211_v39, %v1642_v16  ;;  %v1214_v2 = vsel %vm1213_vm13, %v1208_v11, %v1643_v32 }
 0x262   : > { %v1223_v36 = vsel %vm1219_vm14, %v1217_v0, %v1592_v18  ;;  %v1220_v49 = vsel %vm1219_vm14, %v1214_v2, %v1593_v63 }
 0x263   : > { %v1229_v35 = vsel %vm1225_vm15, %v1223_v36, %v1647_v26  ;;  %v1226_v15 = vsel %vm1225_vm15, %v1220_v49, %v1648_v14 }
 0x264   : > { %v1232_v19 = vpack.c.bf16 %v1229_v35, %v1228_v48 }
 0x266   : > { %v1137_v8 = vpop.permute.xlu0 %1136  ;;  %1267 = vmatpush.bf16.msra.mxu0 %v1232_v19 }
 0x267   : > { %v1215_v51 = vsel %vm1213_vm13, %v1209_v22, %v1137_v8 }
 0x268   : > { %v1221_v46 = vsel %vm1219_vm14, %v1215_v51, %v1157_v1 }
 0x269   : > { %v1227_v31 = vsel %vm1225_vm15, %v1221_v46, %v1177_v29 }
 0x26a   : > { %v1231_v55 = vpack.c.bf16 %v1227_v31, %v1226_v15 }
 0x26c   : > { %1268 = vmatpush.bf16.msra.mxu0 %v1231_v55 }
 0x26e   : > { %v1241_v45 = vpop.permute.xlu0 %1240 }
 0x26f   : > { %1401 = vmatmul.msk.bf16.vlgmr.msra.gmra.mxu0 %vm1253_vm1, %v1406_v4 }
 0x29c   : > { %v1283_v52 = vpop.permute.xlu2 %1282 }
 0x2ec   : > { %v1270_v21 = vpop.f32.mrf.mxu0 }
 0x2ed   : > { %v1271_v42 = vadd.f32 %v1270_v21, %v1241_v45 }
 0x2ef   : > { %v1275_v13 = vmax.f32 %v1271_v42, 0.0 }
 0x2f4   : > { %v1272_v10 = vpop.f32.mrf.mxu0 }
 0x2f5   : > { %v1273_v41 = vadd.f32 %v1272_v10, %v1246_v28 }
 0x2f7   : > { %v1276_v40 = vmax.f32 %v1273_v41, 0.0 }
 0x2f9   : > { %v1278_v38 = vpack.c.bf16 %v1276_v40, %v1275_v13 }
 0x2fb   : > { %1295 = vmatpush.bf16.msra.mxu1 %v1278_v38 }
 0x2fe   : > { %1402 = vmatmul.msk.bf16.vlgmr.msra.gmra.mxu1 %vm1189_vm9, %v1277_v27 }
 0x37b   : > { %v1297_v50 = vpop.f32.mrf.mxu1 }
 0x37c   : > { %v1298_v61 = vadd.f32 %v1297_v50, %v1283_v52 }
 0x37e   : > { %1301 = vst [vmem:[%s244_s26] sm:$0xff] %v1298_v61 }
 0x383   : > { %v1299_v54 = vpop.f32.mrf.mxu1 }
 0x384 PF: > { %s15_s22 = sadd.s32 1, %s1690_s22   ;;  %s2649_s18 = smov %s1682_s20 }
 0x385   : > { %p12_p11 = scmp.ge.s32.totalorder %s15_s22, 6   ;;  %s2650_s19 = smov %s1686_s21 }
 0x386   : > { %s2651_s20 = smov %s2654_s23  ;;  %s2652_s21 = smov %s2658_s24 }
 0x387   :  { %14 = sbr.rel (!%p12_p11) target bundleno = 3 (0x3), region = 73 }

</bundles_post_ra>
